<compile_context>
chip_gen: v5e
topology: v5e:2x2
jax: 0.10.0
libtpu: 0.0.40
codegen_flags: <defaults>
</compile_context>

<pallas_src>
import jax
import jax.numpy as jnp
from jax.experimental import pallas as pl
from jax.experimental.pallas import tpu as pltpu


def _round_up(x: int, m: int) -> int:
    return ((x + m - 1) // m) * m


# ---------------------------------------------------------------------------
# Single-program kernel: whole problem resident in VMEM (small/medium shapes).
# ---------------------------------------------------------------------------
def _linear_relu_single_kernel(x_ref, w_ref, b_ref, o_ref):
    acc = jnp.dot(x_ref[...], w_ref[...], preferred_element_type=jnp.float32)
    o_ref[...] = jnp.maximum(acc + b_ref[...], 0.0).astype(o_ref.dtype)


# ---------------------------------------------------------------------------
# Tiled kernel: grid = (M/tm, N/tn, K/tk) with a resident f32 VMEM accumulator.
# First K step writes (no zero-init pass), later steps accumulate, last step
# fuses bias + ReLU + downcast.
# ---------------------------------------------------------------------------
def _linear_relu_tiled_kernel(x_ref, w_ref, b_ref, o_ref, acc_ref):
    k = pl.program_id(2)
    part = jnp.dot(x_ref[...], w_ref[...], preferred_element_type=jnp.float32)

    @pl.when(k == 0)
    def _():
        acc_ref[...] = part

    @pl.when(k > 0)
    def _():
        acc_ref[...] += part

    @pl.when(k == pl.num_programs(2) - 1)
    def _():
        o_ref[...] = jnp.maximum(acc_ref[...] + b_ref[...], 0.0).astype(o_ref.dtype)


def linear_relu(x, w, b, *, tm=512, tn=512, tk=1024,
                use_bf16=True, single_block=None):
    """ReLU(x @ w + b).

    x: (..., K); w: (K, N) -- pre-transposed nn.Linear weight (torch weight.T);
    b: (N,).  Returns (..., N) in x.dtype.
    """
    orig_shape = x.shape
    K = orig_shape[-1]
    if x.ndim != 2:
        x = x.reshape(-1, K)
    M = x.shape[0]
    Kw, N = w.shape
    assert K == Kw and b.shape == (N,)
    out_dtype = x.dtype

    compute_dtype = jnp.bfloat16 if use_bf16 else x.dtype
    x_c = x if x.dtype == compute_dtype else x.astype(compute_dtype)
    w_c = w if w.dtype == compute_dtype else w.astype(compute_dtype)
    b2 = (b if b.dtype == jnp.float32 else b.astype(jnp.float32)).reshape(1, N)

    in_item = jnp.dtype(compute_dtype).itemsize
    out_item = jnp.dtype(out_dtype).itemsize

    def _maybe_unflatten(o):
        return o.reshape(*orig_shape[:-1], N) if len(orig_shape) != 2 else o

    # ---- single-program fast path: whole problem resident in VMEM ----------
    if single_block is None:
        footprint = (M * K + K * N) * in_item + M * N * max(out_item, 4) + N * 4
        single_block = footprint <= (8 << 20)
    if single_block:
        out = pl.pallas_call(
            _linear_relu_single_kernel,
            out_shape=jax.ShapeDtypeStruct((M, N), out_dtype),
        )(x_c, w_c, b2)
        return _maybe_unflatten(out)

    # ---- tiled (M, N, K) path ----------------------------------------------
    # tm only needs 8-alignment; tn stays a multiple of 256 (full MXU column
    # pass on v6e/v7x); tk is balanced over the K steps so the K zero-pad is
    # small.  M/N edge blocks rely on Pallas' partial-block masking (no wrapper
    # pad/slice round trips).
    tm = min(tm, _round_up(M, 8))
    tn = min(tn, _round_up(N, 256))
    Ka = _round_up(K, 128)
    nk = pl.cdiv(Ka, min(tk, Ka))
    tk = _round_up(pl.cdiv(Ka, nk), 128)
    Kp = pl.cdiv(Ka, tk) * tk

    grid_m = pl.cdiv(M, tm)
    grid_n = pl.cdiv(N, tn)
    # Keep both v7x TensorCores busy if the parallel grid collapsed to 1x1.
    if grid_m == 1 and grid_n == 1:
        if N >= 512:
            tn = _round_up(pl.cdiv(N, 2), 256)
            grid_n = pl.cdiv(N, tn)
        elif M >= 16:
            tm = _round_up(pl.cdiv(M, 2), 8)
            grid_m = pl.cdiv(M, tm)
    grid_k = Kp // tk

    # Zero-pad the contraction dim only (padded K contributes exact zeros).
    if Kp != K:
        x_c = jnp.pad(x_c, ((0, 0), (0, Kp - K)))
        w_c = jnp.pad(w_c, ((0, Kp - K), (0, 0)))

    # VMEM budget: double-buffered x/W/out tiles + f32 accumulator + bias.
    est_vmem = (2 * (tm * tk + tk * tn) * in_item
                + 2 * tm * tn * out_item
                + tm * tn * 4
                + 2 * tn * 4)
    # Raise v5e's 16 MiB scoped default; stay under v7x's 64 MiB physical VMEM.
    vmem_limit = int(max(32 << 20, min(2 * est_vmem, 56 << 20)))

    grid_spec = pltpu.PrefetchScalarGridSpec(
        num_scalar_prefetch=0,
        grid=(grid_m, grid_n, grid_k),
        in_specs=[
            pl.BlockSpec((tm, tk), lambda i, j, k: (i, k)),   # x tile
            pl.BlockSpec((tk, tn), lambda i, j, k: (k, j)),   # W tile
            pl.BlockSpec((1, tn), lambda i, j, k: (0, j)),    # bias tile
        ],
        out_specs=pl.BlockSpec((tm, tn), lambda i, j, k: (i, j)),
        scratch_shapes=[pltpu.VMEM((tm, tn), jnp.float32)],
    )

    out = pl.pallas_call(
        _linear_relu_tiled_kernel,
        out_shape=jax.ShapeDtypeStruct((M, N), out_dtype),
        grid_spec=grid_spec,
        compiler_params=pltpu.CompilerParams(
            dimension_semantics=("parallel", "parallel", "arbitrary"),
            vmem_limit_bytes=vmem_limit,
        ),
    )(x_c, w_c, b2)

    return _maybe_unflatten(out)


if __name__ == "__main__":
    key = jax.random.PRNGKey(0)
    k1, k2, k3, k4, k5, k6 = jax.random.split(key, 6)

    # --- Test 1: module-sized tiny demo -> single-program path, exact f32 ---
    batch, input_dim, hidden_dim = 16, 32, 64
    bound = 1.0 / (input_dim ** 0.5)
    # PyTorch stores weight as (hidden_dim, input_dim); we keep the transposed
    # (input_dim, hidden_dim) copy for the kernel's x @ W layout.
    w_t = jax.random.uniform(k2, (input_dim, hidden_dim),
                             minval=-bound, maxval=bound, dtype=jnp.float32)
    bias = jax.random.uniform(k3, (hidden_dim,),
                              minval=-bound, maxval=bound, dtype=jnp.float32)
    x = jax.random.normal(k1, (batch, input_dim), dtype=jnp.float32)

    out = jax.block_until_ready(linear_relu(x, w_t, bias, use_bf16=False))
    ref = jnp.maximum(x @ w_t + bias, 0.0)
    assert out.shape == (batch, hidden_dim)
    assert jnp.allclose(out, ref, atol=1e-5, rtol=1e-5)

    # --- Test 2: ragged shapes through the tiled path (default bf16 MXU) ----
    # Small tiles to force masked M/N edge blocks and the K zero-pad path.
    M2, K2, N2 = 200, 160, 192
    bound2 = 1.0 / (K2 ** 0.5)
    x2 = jax.random.normal(k4, (M2, K2), dtype=jnp.float32)
    w2 = jax.random.uniform(k5, (K2, N2),
                            minval=-bound2, maxval=bound2, dtype=jnp.float32)
    b2 = jax.random.uniform(k6, (N2,),
                            minval=-bound2, maxval=bound2, dtype=jnp.float32)

    out2 = jax.block_until_ready(
        linear_relu(x2, w2, b2, tm=128, tn=256, tk=128, single_block=False))
    ref2 = jnp.maximum(
        jnp.dot(x2.astype(jnp.bfloat16), w2.astype(jnp.bfloat16),
                preferred_element_type=jnp.float32) + b2, 0.0)
    assert out2.shape == (M2, N2)
    assert jnp.allclose(out2, ref2, atol=2e-3, rtol=2e-3)

    # --- Test 3: same ragged shapes, pure f32 tiled path ---------------------
    out3 = jax.block_until_ready(
        linear_relu(x2, w2, b2, tm=128, tn=256, tk=128,
                    use_bf16=False, single_block=False))
    ref3 = jnp.maximum(x2 @ w2 + b2, 0.0)
    assert jnp.allclose(out3, ref3, atol=1e-4, rtol=1e-4)

    print("KERNEL_OK")
</pallas_src>

<mosaic_0001>
module attributes {stable_mosaic.version = 11 : i64} {
  func.func @_linear_relu_single_kernel(%arg0: memref<16x32xf32, #tpu.memory_space<vmem>>, %arg1: memref<32x64xf32, #tpu.memory_space<vmem>>, %arg2: memref<1x64xf32, #tpu.memory_space<vmem>>, %arg3: memref<16x64xf32, #tpu.memory_space<vmem>>) attributes {dimension_semantics = [], scalar_prefetch = 0 : i64, scratch_operands = 0 : i64, tpu.core_type = #tpu.core_type<tc>} {
    %c0 = arith.constant 0 : index
    %c0_0 = arith.constant 0 : index
    %0 = vector.load %arg0[%c0, %c0_0] : memref<16x32xf32, #tpu.memory_space<vmem>>, vector<16x32xf32>
    %c0_1 = arith.constant 0 : index
    %c0_2 = arith.constant 0 : index
    %1 = vector.load %arg1[%c0_1, %c0_2] : memref<32x64xf32, #tpu.memory_space<vmem>>, vector<32x64xf32>
    %cst = arith.constant dense<0.000000e+00> : vector<16x64xf32>
    %2 = tpu.matmul %0, %1, %cst {dimension_numbers = #tpu.dot_dimension_numbers<[1], [0], [0], [1], [0, 0, 1, 1], [], []>} : vector<16x32xf32>, vector<32x64xf32>, vector<16x64xf32> -> vector<16x64xf32>
    %c0_3 = arith.constant 0 : index
    %c0_4 = arith.constant 0 : index
    %3 = vector.load %arg2[%c0_3, %c0_4] : memref<1x64xf32, #tpu.memory_space<vmem>>, vector<1x64xf32>
    %4 = vector.broadcast %3 : vector<1x64xf32> to vector<16x64xf32>
    %5 = arith.addf %2, %4 : vector<16x64xf32>
    %cst_5 = arith.constant 0.000000e+00 : f32
    %6 = vector.broadcast %cst_5 : f32 to vector<16x64xf32>
    %7 = arith.maximumf %5, %6 : vector<16x64xf32>
    %c0_6 = arith.constant 0 : index
    %c0_7 = arith.constant 0 : index
    %8 = vector.load %arg3[%c0_6, %c0_7] : memref<16x64xf32, #tpu.memory_space<vmem>>, vector<16x64xf32>
    tpu.vector_store %arg3[%c0_6, %c0_7], %7 {strides = array<i32>} : memref<16x64xf32, #tpu.memory_space<vmem>>, vector<16x64xf32>,
    return
  }
}

</mosaic_0001>

<bundles_post_ra>
// kernel: tpu_custom_call.1
= control target key start
LH: loop header
LB: loop body
LE: loop exit
PB: predicated region body
PF: predicated region fallthrough
CT: control target
= control target key end

     0   :  { %8 = vsyncpa [#allocation3], 0  ;;  %s248_s0 = inlined_call_operand.hbm [shape: f32[16,32], index: 0, kind: input, shape index: {}]   ;;  %s249_s1 = inlined_call_operand.hbm [shape: f32[32,64], index: 1, kind: input, shape index: {}]   ;;  %s250_s2 = inlined_call_operand.vmem [shape: f32[1,64], index: 2, kind: input, shape index: {}]   ;;  %s251_s3 = inlined_call_operand.hbm [shape: f32[16,64], index: 3, kind: output, shape index: {}]  }
   0x1   :  { %9 = vsyncpa [#allocation6], 0 }
   0x2   :  { %10 = vsyncpa [#allocation4], 0  ;;  %s15_s14 = sshll.u32 %s248_s0, 4  ;;  %s202_s15 = smov [#allocation2]   ;;  %s16_s14 = int_to_ptr.hbm [resolvable:$true] %s15_s14 }
   0x3   :  { %s17_s16 = sshll.u32 %s202_s15, 4  ;;  %s28_s19 = sshll.u32 %s249_s1, 4  ;;  %s18_s16 = int_to_ptr.vmem [resolvable:$true] %s17_s16  ;;  %s29_s19 = int_to_ptr.hbm [resolvable:$true] %s28_s19 }
   0x4   :  { %s203_s20 = smov 128   ;;  %s204_s21 = smov 8  }
   0x5   :  { %23 = dma.hbm_to_vmem [thread:$0]  %s16_s14, 256, %s18_s16, [#allocation3], %s203_s20, %s203_s20, %s204_s21  }
   0x6   :  { %s205_s22 = smov [#allocation5]  }
   0x7   :  { %s30_s23 = sshll.u32 %s205_s22, 4  ;;  %s31_s23 = int_to_ptr.vmem [resolvable:$true] %s30_s23 }
   0x8   :  { %36 = dma.hbm_to_vmem [thread:$0]  %s29_s19, 512, %s31_s23, [#allocation6], %s203_s20, %s203_s20, %s204_s21  }
   0x9   :  { %196 = dma.done.wait [#allocation3], 256  }
   0xa   :  { %197 = vsyncadd [#allocation3], 4294967040 }
   0xb   :  { %198 = dma.done.wait [#allocation6], 512  }
   0xc   :  { %199 = vsyncadd [#allocation6], 4294966784  ;;  %v52_v0 = vld [vmem:[#allocation5 + $0x18] sm:$0xff]  ;;  %v51_v1 = vld [vmem:[#allocation5 + $0x10] sm:$0xff]  ;;  %vm57_vm0 = vcmask 261120   ;;  %s206_s24 = smov [#allocation7]  }
   0xd   :  { %76 = vmatpush.msra.mxu0 %v52_v0  ;;  %114 = vmatpush.msra.mxu1 %v52_v0  ;;  %v50_v2 = vld [vmem:[#allocation5 + $0x8] sm:$0xff]  ;;  %v49_v3 = vld [vmem:[#allocation5] sm:$0xff]  ;;  %v47_v4 = vld [vmem:[#allocation2] sm:$0xff]  ;;  %s96_s25 = sshll.u32 %s206_s24, 4  ;;  %s98_s28 = sshll.u32 %s251_s3, 4  ;;  %vm89_vm1 = vcmask 523264   ;;  %s97_s25 = int_to_ptr.vmem [resolvable:$true] %s96_s25  ;;  %s99_s28 = int_to_ptr.hbm [resolvable:$true] %s98_s28 }
   0xe   :  { %v48_v5 = vld [vmem:[#allocation2 + $0x8] sm:$0xff]  ;;  %v123_v6 = vld [vmem:[%s250_s2] ss:$0 sm:$0xff] }
   0xf   :  { %77 = vmatpush.msra.mxu0 %v51_v1  ;;  %115 = vmatpush.msra.mxu1 %v51_v1 }
  0x11   :  { %78 = vmatpush.msra.mxu0 %v50_v2  ;;  %116 = vmatpush.msra.mxu1 %v50_v2 }
  0x13   :  { %79 = vmatpush.msra.mxu0 %v49_v3  ;;  %117 = vmatpush.msra.mxu1 %v49_v3 }
  0x14   :  { %112 = vmatmul.msk.f32.vlgmr.msra.gmra.mxu0 %vm57_vm0, %v47_v4  ;;  %113 = vmatmul.msk.f32.vlgmr.msra.gmra.mxu1 %vm57_vm0, %v48_v5 }
  0x91   :  { %v81_v7 = vpop.f32.mrf.mxu0  ;;  %v84_v8 = vpop.f32.mrf.mxu1 }
  0x92   :  { %v82_v9 = vadd.f32 %v123_v6, %v81_v7  ;;  %v85_v10 = vadd.f32 %v123_v6, %v84_v8 }
  0x94   :  { %v87_v11 = vmax.f32 %v82_v9, 0.0  ;;  %v88_v12 = vmax.f32 %v85_v10, 0.0 }
  0x96   :  { %90 = vst.msk [vmem:[#allocation7] sm:$0xff] %vm89_vm1, %v87_v11 }
  0x97   :  { %91 = vst.msk [vmem:[#allocation7 + $0x8] sm:$0xff] %vm89_vm1, %v88_v12 }
  0x98   :  { %104 = dma.vmem_to_hbm [thread:$0]  %s97_s25, 256, %s99_s28, [#allocation4], %s203_s20, %s203_s20, %s204_s21  }
  0x99   :  { %200 = dma.done.wait [#allocation4], 256  }
  0x9a   :  { %201 = vsyncadd [#allocation4], 4294967040 }
  0x9b   :  { %109 = vsyncpa [#allocation3], 1 }
  0x9c   :  { %110 = vsyncpa [#allocation6], 1 }
  0x9d   :  { %111 = vsyncpa [#allocation4], 1 }

</bundles_post_ra>
